<compile_context>
chip_gen: v7x
topology: tpu7x:2x2x1
jax: 0.10.0
libtpu: 0.0.40
codegen_flags: <defaults>
</compile_context>

<pallas_src>
import jax
import jax.numpy as jnp
from jax import lax
from jax.experimental import pallas as pl
from jax.experimental.pallas import tpu as pltpu


def _round_up(v, m):
    return (v + m - 1) // m * m


_INV_SQRT2 = 0.7071067811865476


def _gelu_exact(x):
    # nn.GELU() default is the exact (erf-based) GELU; computed in f32.
    return 0.5 * x * (1.0 + lax.erf(x * _INV_SQRT2))


def mlp_kernel(x_ref, w1_ref, b1_ref, w2_ref, b2_ref, o_ref, acc_ref):
    h_idx = pl.program_id(1)

    @pl.when(h_idx == 0)
    def _():
        acc_ref[...] = jnp.zeros_like(acc_ref)

    # fc1 for this H-chunk: [tm, Cin] @ [Cin, th] + b1, then exact GELU (f32).
    h = jnp.dot(x_ref[...], w1_ref[...], preferred_element_type=jnp.float32)
    h = _gelu_exact(h + b1_ref[...].astype(jnp.float32))

    # Partial fc2: accumulate [tm, th] @ [th, Cout] into the f32 scratch.
    # (dropout p=0.0 is identity)
    acc_ref[...] += jnp.dot(h.astype(w2_ref.dtype), w2_ref[...],
                            preferred_element_type=jnp.float32)

    @pl.when(h_idx == pl.num_programs(1) - 1)
    def _():
        o_ref[...] = (acc_ref[...]
                      + b2_ref[...].astype(jnp.float32)).astype(o_ref.dtype)


def mlp_pallas(x, w1, b1, w2, b2, *, tm=256, th=512):
    """x: [B, S, Cin].  w1: [Cin, H], b1: [H], w2: [H, Cout], b2: [Cout].

    Weights are stored transposed relative to nn.Linear.weight ([in, out]),
    matching y = x @ W + b.
    """
    B, S, Cin = x.shape
    H = w1.shape[1]
    Cout = w2.shape[1]
    M = B * S

    # Lane-dense padding: features to multiples of 128 so stores are unmasked
    # vst; row tile aligned to sublane packing (16 for bf16, 8 for f32).
    row_align = 16 if x.dtype == jnp.bfloat16 else 8
    cin_p = _round_up(Cin, 128)
    cout_p = _round_up(Cout, 128)
    th = min(th, _round_up(H, 128))
    h_p = _round_up(H, th)
    tm = min(tm, _round_up(M, row_align))
    m_p = _round_up(M, tm)

    x2 = jnp.pad(x.reshape(M, Cin), ((0, m_p - M), (0, cin_p - Cin)))
    w1_p = jnp.pad(w1, ((0, cin_p - Cin), (0, h_p - H)))
    b1_p = jnp.pad(b1, (0, h_p - H)).reshape(1, h_p)
    w2_p = jnp.pad(w2, ((0, h_p - H), (0, cout_p - Cout)))
    b2_p = jnp.pad(b2, (0, cout_p - Cout)).reshape(1, cout_p)

    grid = (m_p // tm, h_p // th)

    bytes_per_elem = jnp.dtype(x.dtype).itemsize
    cost = pl.CostEstimate(
        flops=2 * M * (Cin * H + H * Cout),
        transcendentals=M * H,  # erf in the GELU
        bytes_accessed=(x2.size + w1_p.size + w2_p.size + b1_p.size
                        + b2_p.size + m_p * cout_p) * bytes_per_elem,
    )

    out2 = pl.pallas_call(
        mlp_kernel,
        out_shape=jax.ShapeDtypeStruct((m_p, cout_p), x.dtype),
        grid_spec=pltpu.PrefetchScalarGridSpec(
            num_scalar_prefetch=0,
            grid=grid,
            in_specs=[
                pl.BlockSpec((tm, cin_p), lambda i, h: (i, 0)),    # x row tile
                pl.BlockSpec((cin_p, th), lambda i, h: (0, h)),    # W1 H-chunk
                pl.BlockSpec((1, th), lambda i, h: (0, h)),        # b1 chunk
                pl.BlockSpec((th, cout_p), lambda i, h: (h, 0)),   # W2 H-chunk
                pl.BlockSpec((1, cout_p), lambda i, h: (0, 0)),    # b2
            ],
            out_specs=pl.BlockSpec((tm, cout_p), lambda i, h: (i, 0)),
            scratch_shapes=[pltpu.VMEM((tm, cout_p), jnp.float32)],
        ),
        compiler_params=pltpu.CompilerParams(
            dimension_semantics=("parallel", "arbitrary"),
            vmem_limit_bytes=64 * 1024 * 1024,
        ),
        cost_estimate=cost,
    )(x2, w1_p, b1_p, w2_p, b2_p)

    return out2[:M, :Cout].reshape(B, S, Cout)


def mlp_reference(x, w1, b1, w2, b2):
    h = jnp.einsum("bsc,ch->bsh", x, w1) + b1
    h = 0.5 * h * (1.0 + lax.erf(h * _INV_SQRT2))
    return jnp.einsum("bsh,ho->bso", h, w2) + b2


if __name__ == "__main__":
    # Small shapes consistent with the module: batch=2, seq=8,
    # in_features=32, hidden_features=64, out_features=32.
    B, S = 2, 8
    Cin, Hdim, Cout = 32, 64, 32

    key = jax.random.PRNGKey(0)
    kx, k1, k2, k3, k4 = jax.random.split(key, 5)

    x = jax.random.normal(kx, (B, S, Cin), dtype=jnp.float32)

    # Deterministic parameter init (PyTorch-Linear-style uniform bounds).
    lim1 = 1.0 / jnp.sqrt(Cin)
    lim2 = 1.0 / jnp.sqrt(Hdim)
    # Stored already transposed relative to nn.Linear.weight: [in, out].
    w1 = jax.random.uniform(k1, (Cin, Hdim), jnp.float32, -lim1, lim1)
    b1 = jax.random.uniform(k2, (Hdim,), jnp.float32, -lim1, lim1)
    w2 = jax.random.uniform(k3, (Hdim, Cout), jnp.float32, -lim2, lim2)
    b2 = jax.random.uniform(k4, (Cout,), jnp.float32, -lim2, lim2)

    out = mlp_pallas(x, w1, b1, w2, b2)
    out = jax.block_until_ready(out)

    ref = mlp_reference(x, w1, b1, w2, b2)
    assert out.shape == (B, S, Cout)
    assert jnp.allclose(out, ref, atol=1e-4, rtol=1e-4)

    print("KERNEL_OK")
</pallas_src>

<mosaic_0001>
module attributes {stable_mosaic.version = 11 : i64} {
  func.func @mlp_kernel(%arg0: i32, %arg1: i32, %arg2: memref<16x128xf32, #tpu.memory_space<vmem>>, %arg3: memref<128x128xf32, #tpu.memory_space<vmem>>, %arg4: memref<1x128xf32, #tpu.memory_space<vmem>>, %arg5: memref<128x128xf32, #tpu.memory_space<vmem>>, %arg6: memref<1x128xf32, #tpu.memory_space<vmem>>, %arg7: memref<16x128xf32, #tpu.memory_space<vmem>>, %arg8: memref<16x128xf32, #tpu.memory_space<vmem>>) attributes {dimension_semantics = [#tpu.dimension_semantics<parallel>, #tpu.dimension_semantics<arbitrary>], iteration_bounds = array<i64: 1, 1>, scalar_prefetch = 0 : i64, scratch_operands = 1 : i64, tpu.core_type = #tpu.core_type<tc>, window_params = [{transform_indices = @transform_0, window_bounds = array<i64: 16, 128>}, {transform_indices = @transform_1, window_bounds = array<i64: 128, 128>}, {transform_indices = @transform_2, window_bounds = array<i64: 1, 128>}, {transform_indices = @transform_3, window_bounds = array<i64: 128, 128>}, {pipeline_mode = #tpu.pipeline_mode<synchronous>, transform_indices = @transform_4, window_bounds = array<i64: 1, 128>}, {transform_indices = @transform_5, window_bounds = array<i64: 16, 128>}]} {
    %c0_i32 = arith.constant 0 : i32
    %0 = arith.cmpi eq, %arg1, %c0_i32 : i32
    %1 = arith.extui %0 : i1 to i32
    %c0_i32_0 = arith.constant 0 : i32
    %2 = arith.cmpi ne, %1, %c0_i32_0 : i32
    scf.if %2 {
      %cst_18 = arith.constant 0.000000e+00 : f32
      %25 = vector.broadcast %cst_18 : f32 to vector<16x128xf32>
      %c0_19 = arith.constant 0 : index
      %c0_20 = arith.constant 0 : index
      %26 = vector.load %arg8[%c0_19, %c0_20] : memref<16x128xf32, #tpu.memory_space<vmem>>, vector<16x128xf32>
      tpu.vector_store %arg8[%c0_19, %c0_20], %25 {strides = array<i32>} : memref<16x128xf32, #tpu.memory_space<vmem>>, vector<16x128xf32>,
    } else {
    }
    %c0 = arith.constant 0 : index
    %c0_1 = arith.constant 0 : index
    %3 = vector.load %arg2[%c0, %c0_1] : memref<16x128xf32, #tpu.memory_space<vmem>>, vector<16x128xf32>
    %c0_2 = arith.constant 0 : index
    %c0_3 = arith.constant 0 : index
    %4 = vector.load %arg3[%c0_2, %c0_3] : memref<128x128xf32, #tpu.memory_space<vmem>>, vector<128x128xf32>
    %cst = arith.constant dense<0.000000e+00> : vector<16x128xf32>
    %5 = tpu.matmul %3, %4, %cst {dimension_numbers = #tpu.dot_dimension_numbers<[1], [0], [0], [1], [0, 0, 1, 1], [], []>} : vector<16x128xf32>, vector<128x128xf32>, vector<16x128xf32> -> vector<16x128xf32>
    %c0_4 = arith.constant 0 : index
    %c0_5 = arith.constant 0 : index
    %6 = vector.load %arg4[%c0_4, %c0_5] : memref<1x128xf32, #tpu.memory_space<vmem>>, vector<1x128xf32>
    %7 = vector.broadcast %6 : vector<1x128xf32> to vector<16x128xf32>
    %8 = arith.addf %5, %7 : vector<16x128xf32>
    %cst_6 = arith.constant 5.000000e-01 : f32
    %9 = vector.broadcast %cst_6 : f32 to vector<16x128xf32>
    %10 = arith.mulf %9, %8 : vector<16x128xf32>
    %cst_7 = arith.constant 0.707106769 : f32
    %11 = vector.broadcast %cst_7 : f32 to vector<16x128xf32>
    %12 = arith.mulf %8, %11 : vector<16x128xf32>
    %13 = math.erf %12 : vector<16x128xf32>
    %cst_8 = arith.constant 1.000000e+00 : f32
    %14 = vector.broadcast %cst_8 : f32 to vector<16x128xf32>
    %15 = arith.addf %14, %13 : vector<16x128xf32>
    %16 = arith.mulf %10, %15 : vector<16x128xf32>
    %c0_9 = arith.constant 0 : index
    %c0_10 = arith.constant 0 : index
    %17 = vector.load %arg8[%c0_9, %c0_10] : memref<16x128xf32, #tpu.memory_space<vmem>>, vector<16x128xf32>
    %c0_11 = arith.constant 0 : index
    %c0_12 = arith.constant 0 : index
    %18 = vector.load %arg5[%c0_11, %c0_12] : memref<128x128xf32, #tpu.memory_space<vmem>>, vector<128x128xf32>
    %cst_13 = arith.constant dense<0.000000e+00> : vector<16x128xf32>
    %19 = tpu.matmul %16, %18, %cst_13 {dimension_numbers = #tpu.dot_dimension_numbers<[1], [0], [0], [1], [0, 0, 1, 1], [], []>} : vector<16x128xf32>, vector<128x128xf32>, vector<16x128xf32> -> vector<16x128xf32>
    %20 = arith.addf %17, %19 : vector<16x128xf32>
    %c0_14 = arith.constant 0 : index
    %c0_15 = arith.constant 0 : index
    %21 = vector.load %arg8[%c0_14, %c0_15] : memref<16x128xf32, #tpu.memory_space<vmem>>, vector<16x128xf32>
    tpu.vector_store %arg8[%c0_14, %c0_15], %20 {strides = array<i32>} : memref<16x128xf32, #tpu.memory_space<vmem>>, vector<16x128xf32>,
    %c0_i32_16 = arith.constant 0 : i32
    %22 = arith.cmpi eq, %arg1, %c0_i32_16 : i32
    %23 = arith.extui %22 : i1 to i32
    %c0_i32_17 = arith.constant 0 : i32
    %24 = arith.cmpi ne, %23, %c0_i32_17 : i32
    scf.if %24 {
      %c0_18 = arith.constant 0 : index
      %c0_19 = arith.constant 0 : index
      %25 = vector.load %arg8[%c0_18, %c0_19] : memref<16x128xf32, #tpu.memory_space<vmem>>, vector<16x128xf32>
      %c0_20 = arith.constant 0 : index
      %c0_21 = arith.constant 0 : index
      %26 = vector.load %arg6[%c0_20, %c0_21] : memref<1x128xf32, #tpu.memory_space<vmem>>, vector<1x128xf32>
      %27 = vector.broadcast %26 : vector<1x128xf32> to vector<16x128xf32>
      %28 = arith.addf %25, %27 : vector<16x128xf32>
      %c0_22 = arith.constant 0 : index
      %c0_23 = arith.constant 0 : index
      %29 = vector.load %arg7[%c0_22, %c0_23] : memref<16x128xf32, #tpu.memory_space<vmem>>, vector<16x128xf32>
      tpu.vector_store %arg7[%c0_22, %c0_23], %28 {strides = array<i32>} : memref<16x128xf32, #tpu.memory_space<vmem>>, vector<16x128xf32>,
    } else {
    }
    return
  }
  func.func @transform_0(%arg0: i32, %arg1: i32) -> (i32, i32) {
    %c0_i32 = arith.constant 0 : i32
    %c0_i32_0 = arith.constant 0 : i32
    return %arg0, %c0_i32 : i32, i32
  }
  func.func @transform_1(%arg0: i32, %arg1: i32) -> (i32, i32) {
    %c0_i32 = arith.constant 0 : i32
    %c0_i32_0 = arith.constant 0 : i32
    return %c0_i32, %arg1 : i32, i32
  }
  func.func @transform_2(%arg0: i32, %arg1: i32) -> (i32, i32) {
    %c0_i32 = arith.constant 0 : i32
    %c0_i32_0 = arith.constant 0 : i32
    return %c0_i32, %arg1 : i32, i32
  }
  func.func @transform_3(%arg0: i32, %arg1: i32) -> (i32, i32) {
    %c0_i32 = arith.constant 0 : i32
    %c0_i32_0 = arith.constant 0 : i32
    return %arg1, %c0_i32 : i32, i32
  }
  func.func @transform_4(%arg0: i32, %arg1: i32) -> (i32, i32) {
    %c0_i32 = arith.constant 0 : i32
    %c0_i32_0 = arith.constant 0 : i32
    %c0_i32_1 = arith.constant 0 : i32
    return %c0_i32, %c0_i32_0 : i32, i32
  }
  func.func @transform_5(%arg0: i32, %arg1: i32) -> (i32, i32) {
    %c0_i32 = arith.constant 0 : i32
    %c0_i32_0 = arith.constant 0 : i32
    return %arg0, %c0_i32 : i32, i32
  }
}

</mosaic_0001>

<bundles_post_ra>
// kernel: tpu_custom_call.1
= control target key start
LH: loop header
LB: loop body
LE: loop exit
PB: predicated region body
PF: predicated region fallthrough
CT: control target
= control target key end

     0   :  { %10 = vsyncpa [#allocation4], 0  ;;  %s786_s0 = inlined_call_operand.hbm [shape: f32[16,128], index: 0, kind: input, shape index: {}]   ;;  %s787_s1 = inlined_call_operand.hbm [shape: f32[128,128], index: 1, kind: input, shape index: {}]   ;;  %s788_s2 = inlined_call_operand.hbm [shape: f32[1,128], index: 2, kind: input, shape index: {}]   ;;  %s789_s3 = inlined_call_operand.hbm [shape: f32[128,128], index: 3, kind: input, shape index: {}]   ;;  %s790_s4 = inlined_call_operand.hbm [shape: f32[1,128], index: 4, kind: input, shape index: {}]   ;;  %s791_s5 = inlined_call_operand.hbm [shape: f32[16,128], index: 5, kind: output, shape index: {}]  }
   0x1   :  { %11 = vsyncpa [#allocation7], 0 }
   0x2   :  { %12 = vsyncpa [#allocation10], 0 }
   0x3   :  { %13 = vsyncpa [#allocation5], 0  ;;  %s657_s18 = smov [#allocation6]   ;;  %s658_s20 = smov [#allocation9]  }
   0x4   :  { %s31_s19 = sshll.u32 %s657_s18, 4  ;;  %s53_s21 = sshll.u32 %s658_s20, 4  ;;  %s32_s19 = int_to_ptr.vmem [resolvable:$true] %s31_s19  ;;  %s695_s21 = int_to_ptr.vmem [resolvable:$true] %s53_s21 }
   0x5   :  { %s517_s24 = scalar_lea.hbm %s787_s1, 2048 }
   0x6   :  { %p518_p0 = scmp.ne.s32.totalorder %s787_s1, %s517_s24  ;;  %p521_p1 = scmp.lt.u32.totalorder %s517_s24, %s787_s1 }
   0x8   :  { %p523_p2 = pnand %p521_p1, %p518_p0 }
   0xa   :  { %526 = shalt.err (!%p523_p2)
}
   0xb   :  { %s527_s29 = scalar_lea.vmem %s32_s19, 2048  ;;  %p532_p4 = scmp.lt.s32.totalorder %s32_s19, %s32_s19 }
   0xc   :  { %p528_p3 = scmp.ne.s32.totalorder %s32_s19, %s527_s29  ;;  %p533_p5 = scmp.lt.s32.totalorder %s527_s29, %s527_s29 }
   0xe   :  { %p534_p6 = por %p533_p5, %p532_p4 }
  0x10   :  { %p535_p7 = pnand %p534_p6, %p528_p3 }
  0x12   :  { %538 = shalt.err (!%p535_p7)
}
  0x13   :  { %s659_s30 = smov 128   ;;  %s660_s6 = smov 8  }
  0x14   :  { %37 = dma.hbm_to_vmem [thread:$0]  %s787_s1, 2048, %s32_s19, [#allocation7], %s659_s30, %s659_s30, %s660_s6  }
  0x15   :  { %s539_s11 = scalar_lea.hbm %s789_s3, 2048 }
  0x16   :  { %p540_p8 = scmp.ne.s32.totalorder %s789_s3, %s539_s11  ;;  %p543_p9 = scmp.lt.u32.totalorder %s539_s11, %s789_s3 }
  0x18   :  { %p545_p10 = pnand %p543_p9, %p540_p8 }
  0x1a   :  { %548 = shalt.err (!%p545_p10)
}
  0x1b   :  { %s549_s16 = scalar_lea.vmem %s695_s21, 2048  ;;  %p554_p12 = scmp.lt.s32.totalorder %s695_s21, %s695_s21 }
  0x1c   :  { %p550_p11 = scmp.ne.s32.totalorder %s695_s21, %s549_s16  ;;  %p555_p13 = scmp.lt.s32.totalorder %s549_s16, %s549_s16 }
  0x1e   :  { %p556_p0 = por %p555_p13, %p554_p12 }
  0x20   :  { %p557_p1 = pnand %p556_p0, %p550_p11 }
  0x22   :  { %560 = shalt.err (!%p557_p1)
}
  0x23   :  { %59 = dma.hbm_to_vmem [thread:$0]  %s789_s3, 2048, %s695_s21, [#allocation10], %s659_s30, %s659_s30, %s660_s6  }
  0x24   :  { %s661_s18 = smov [#allocation3]   ;;  %s662_s20 = smov [#allocation8]  }
  0x25   :  { %s19_s19 = sshll.u32 %s661_s18, 4  ;;  %s44_s22 = sshll.u32 %s662_s20, 4  ;;  %s20_s19 = int_to_ptr.vmem [resolvable:$true] %s19_s19  ;;  %s45_s22 = int_to_ptr.vmem [resolvable:$true] %s44_s22 }
  0x26   :  { %s561_s25 = scalar_lea.hbm %s786_s0, 256 }
  0x27   :  { %p562_p2 = scmp.ne.s32.totalorder %s786_s0, %s561_s25  ;;  %p565_p3 = scmp.lt.u32.totalorder %s561_s25, %s786_s0 }
  0x29   :  { %p567_p4 = pnand %p565_p3, %p562_p2 }
  0x2b   :  { %570 = shalt.err (!%p567_p4)
}
  0x2c   :  { %s571_s3 = scalar_lea.vmem %s20_s19, 256  ;;  %p576_p6 = scmp.lt.s32.totalorder %s20_s19, %s20_s19 }
  0x2d   :  { %p572_p5 = scmp.ne.s32.totalorder %s20_s19, %s571_s3  ;;  %p577_p7 = scmp.lt.s32.totalorder %s571_s3, %s571_s3 }
  0x2f   :  { %p578_p8 = por %p577_p7, %p576_p6 }
  0x31   :  { %p579_p9 = pnand %p578_p8, %p572_p5 }
  0x33   :  { %582 = shalt.err (!%p579_p9)
}
  0x34   :  { %25 = dma.hbm_to_vmem [thread:$0]  %s786_s0, 256, %s20_s19, [#allocation4], %s659_s30, %s659_s30, %s660_s6  }
  0x35   :  { %s583_s10 = scalar_lea.hbm %s788_s2, 16 }
  0x36   :  { %p584_p10 = scmp.ne.s32.totalorder %s788_s2, %s583_s10  ;;  %p587_p11 = scmp.lt.u32.totalorder %s583_s10, %s788_s2 }
  0x38   :  { %p589_p12 = pnand %p587_p11, %p584_p10 }
  0x3a   :  { %592 = shalt.err (!%p589_p12)
}
  0x3b   :  { %s593_s15 = scalar_lea.vmem %s45_s22, 16  ;;  %s597_s16 = scalar_lea.vmem %s45_s22, 32 }
  0x3c   :  { %p594_p13 = scmp.ne.s32.totalorder %s45_s22, %s593_s15  ;;  %p598_p0 = scmp.lt.s32.totalorder %s45_s22, %s45_s22 }
  0x3d   :  { %p599_p1 = scmp.lt.s32.totalorder %s597_s16, %s593_s15 }
  0x3f   :  { %p600_p2 = por %p599_p1, %p598_p0 }
  0x41   :  { %p601_p3 = pnand %p600_p2, %p594_p13 }
  0x43   :  { %604 = shalt.err (!%p601_p3)
}
  0x44   :  { %47 = dma.hbm_to_vmem [thread:$0]  %s788_s2, 16, %s45_s22, [#allocation7]  }
  0x45   :  { %s663_s17 = smov [#allocation11]   ;;  %s605_s23 = scalar_lea.hbm %s790_s4, 16 }
  0x46   :  { %s66_s18 = sshll.u32 %s663_s17, 4  ;;  %p606_p4 = scmp.ne.s32.totalorder %s790_s4, %s605_s23  ;;  %s67_s18 = int_to_ptr.vmem [resolvable:$true] %s66_s18 }
  0x47   :  { %p609_p5 = scmp.lt.u32.totalorder %s605_s23, %s790_s4 }
  0x49   :  { %p611_p6 = pnand %p609_p5, %p606_p4 }
  0x4b   :  { %614 = shalt.err (!%p611_p6)
}
  0x4c   :  { %s615_s28 = scalar_lea.vmem %s67_s18, 16  ;;  %s619_s2 = scalar_lea.vmem %s67_s18, 32 }
  0x4d   :  { %p616_p7 = scmp.ne.s32.totalorder %s67_s18, %s615_s28  ;;  %p620_p8 = scmp.lt.s32.totalorder %s67_s18, %s67_s18 }
  0x4e   :  { %p621_p9 = scmp.lt.s32.totalorder %s619_s2, %s615_s28 }
  0x50   :  { %p622_p10 = por %p621_p9, %p620_p8 }
  0x52   :  { %p623_p11 = pnand %p622_p10, %p616_p7 }
  0x54   :  { %626 = shalt.err (!%p623_p11)
}
  0x55   :  { %69 = dma.hbm_to_vmem [thread:$0]  %s790_s4, 16, %s67_s18, [#allocation10]  }
  0x56   :  { %649 = dma.done.wait [#allocation4], 256  }
  0x57   :  { %650 = vsyncadd [#allocation4], 4294967040 }
  0x58   :  { %651 = dma.done.wait [#allocation7], 2064  }
  0x59   :  { %652 = vsyncadd [#allocation7], 4294965232 }
  0x5a   :  { %653 = dma.done.wait [#allocation10], 2064  }
  0x5b   :  { %654 = vsyncadd [#allocation10], 4294965232  ;;  %v93_v0 = vld [vmem:[#allocation6] sm:$0xff]  ;;  %v94_v1 = vld [vmem:[#allocation6 + $0x8] sm:$0xff]  ;;  %s664_s4 = smov [#allocation12]  }
  0x5c   :  { %v95_v2 = vld [vmem:[#allocation6 + $0x10] sm:$0xff]  ;;  %v441_v3 = vpack.c.bf16 %v94_v1, %v93_v0  ;;  %v96_v4 = vld [vmem:[#allocation6 + $0x18] sm:$0xff]  ;;  %v97_v6 = vld [vmem:[#allocation6 + $0x20] sm:$0xff]  ;;  %s319_s3 = sshll.u32 %s664_s4, 4  ;;  %s320_s3 = int_to_ptr.vmem [resolvable:$true] %s319_s3 }
  0x5d   :  { %v445_v5 = vpack.c.bf16 %v96_v4, %v95_v2  ;;  %v98_v7 = vld [vmem:[#allocation6 + $0x28] sm:$0xff]  ;;  %v99_v9 = vld [vmem:[#allocation6 + $0x30] sm:$0xff]  ;;  %v100_v10 = vld [vmem:[#allocation6 + $0x38] sm:$0xff]  ;;  %s627_s21 = scalar_lea.vmem %s320_s3, 256  ;;  %p632_p13 = scmp.lt.s32.totalorder %s320_s3, %s320_s3 }
  0x5e   :  { %442 = vmatprep.subr.bf16.mxu0 %v441_v3  ;;  %v449_v8 = vpack.c.bf16 %v98_v7, %v97_v6  ;;  %v91_v11 = vld [vmem:[#allocation3] sm:$0xff]  ;;  %v203_v12 = vld [vmem:[#allocation9] sm:$0xff]  ;;  %v206_v16 = vld [vmem:[#allocation9 + $0x18] sm:$0xff]  ;;  %v453_v20 = vpack.c.bf16 %v100_v10, %v99_v9  ;;  %p628_p12 = scmp.ne.s32.totalorder %s320_s3, %s627_s21  ;;  %p633_p0 = scmp.lt.s32.totalorder %s627_s21, %s627_s21 }
  0x5f   :  { %444 = vmatpush3.bf16.msra.mxu0 %v441_v3  ;;  %403 = vmatprep.mubr.f32.mxu0 %v91_v11  ;;  %v204_v13 = vld [vmem:[#allocation9 + $0x8] sm:$0xff]  ;;  %v205_v14 = vld [vmem:[#allocation9 + $0x10] sm:$0xff]  ;;  %v207_v18 = vld [vmem:[#allocation9 + $0x20] sm:$0xff] }
  0x60   :  { %446 = vmatprep.subr.bf16.mxu0 %v445_v5  ;;  %v473_v15 = vpack.c.bf16 %v204_v13, %v203_v12  ;;  %v477_v17 = vpack.c.bf16 %v206_v16, %v205_v14  ;;  %v208_v19 = vld [vmem:[#allocation9 + $0x28] sm:$0xff]  ;;  %v101_v21 = vld [vmem:[#allocation6 + $0x40] sm:$0xff]  ;;  %v104_v26 = vld [vmem:[#allocation6 + $0x58] sm:$0xff]  ;;  %p634_p1 = por %p633_p0, %p632_p13 }
  0x61   :  { %v102_v22 = vld [vmem:[#allocation6 + $0x48] sm:$0xff]  ;;  %v481_v23 = vpack.c.bf16 %v208_v19, %v207_v18  ;;  %v103_v25 = vld [vmem:[#allocation6 + $0x50] sm:$0xff]  ;;  %v105_v28 = vld [vmem:[#allocation6 + $0x60] sm:$0xff] }
  0x62   :  { %474 = vmatprep.subr.bf16.mxu1 %v473_v15  ;;  %v457_v24 = vpack.c.bf16 %v102_v22, %v101_v21  ;;  %v461_v27 = vpack.c.bf16 %v104_v26, %v103_v25  ;;  %v106_v29 = vld [vmem:[#allocation6 + $0x68] sm:$0xff]  ;;  %v107_v31 = vld [vmem:[#allocation6 + $0x70] sm:$0xff]  ;;  %v108_v32 = vld [vmem:[#allocation6 + $0x78] sm:$0xff]  ;;  %p635_p2 = pnand %p634_p1, %p628_p12 }
  0x63   :  { %448 = vmatpush3.bf16.msra.mxu0 %v445_v5  ;;  %476 = vmatpush3.bf16.msra.mxu1 %v473_v15  ;;  %v465_v30 = vpack.c.bf16 %v106_v29, %v105_v28  ;;  %v469_v33 = vpack.c.bf16 %v108_v32, %v107_v31  ;;  %v92_v34 = vld [vmem:[#allocation3 + $0x8] sm:$0xff]  ;;  %v211_v38 = vld [vmem:[#allocation9 + $0x40] sm:$0xff]  ;;  %v212_v39 = vld [vmem:[#allocation9 + $0x48] sm:$0xff] }
  0x64   :  { %450 = vmatprep.subr.bf16.mxu0 %v449_v8  ;;  %478 = vmatprep.subr.bf16.mxu1 %v477_v17  ;;  %v209_v35 = vld [vmem:[#allocation9 + $0x30] sm:$0xff]  ;;  %v210_v36 = vld [vmem:[#allocation9 + $0x38] sm:$0xff]  ;;  %v489_v40 = vpack.c.bf16 %v212_v39, %v211_v38  ;;  %v215_v44 = vld [vmem:[#allocation9 + $0x60] sm:$0xff] }
  0x65   :  { %v485_v37 = vpack.c.bf16 %v210_v36, %v209_v35  ;;  %v213_v41 = vld [vmem:[#allocation9 + $0x50] sm:$0xff]  ;;  %v214_v42 = vld [vmem:[#allocation9 + $0x58] sm:$0xff]  ;;  %v216_v45 = vld [vmem:[#allocation9 + $0x68] sm:$0xff] }
  0x66   :  { %v493_v43 = vpack.c.bf16 %v214_v42, %v213_v41  ;;  %v497_v46 = vpack.c.bf16 %v216_v45, %v215_v44  ;;  %v217_v47 = vld [vmem:[#allocation9 + $0x70] sm:$0xff]  ;;  %v218_v48 = vld [vmem:[#allocation9 + $0x78] sm:$0xff]  ;;  %v334_v1 = vld [vmem:[#allocation11] ss:$0 sm:$0xff] }
  0x67   :  { %452 = vmatpush3.bf16.msra.mxu0 %v449_v8  ;;  %480 = vmatpush3.bf16.msra.mxu1 %v477_v17  ;;  %v501_v49 = vpack.c.bf16 %v218_v48, %v217_v47  ;;  %v333_v50 = vld [vmem:[#allocation8] ss:$0 sm:$0xff] }
  0x68   :  { %454 = vmatprep.subr.bf16.mxu0 %v453_v20  ;;  %482 = vmatprep.subr.bf16.mxu1 %v481_v23 }
  0x6b   :  { %456 = vmatpush3.bf16.msra.mxu0 %v453_v20  ;;  %484 = vmatpush3.bf16.msra.mxu1 %v481_v23 }
  0x6c   :  { %458 = vmatprep.subr.bf16.mxu0 %v457_v24  ;;  %486 = vmatprep.subr.bf16.mxu1 %v485_v37 }
  0x6f   :  { %460 = vmatpush3.bf16.msra.mxu0 %v457_v24  ;;  %488 = vmatpush3.bf16.msra.mxu1 %v485_v37 }
  0x70   :  { %462 = vmatprep.subr.bf16.mxu0 %v461_v27  ;;  %490 = vmatprep.subr.bf16.mxu1 %v489_v40 }
  0x73   :  { %464 = vmatpush3.bf16.msra.mxu0 %v461_v27  ;;  %492 = vmatpush3.bf16.msra.mxu1 %v489_v40 }
  0x74   :  { %466 = vmatprep.subr.bf16.mxu0 %v465_v30  ;;  %494 = vmatprep.subr.bf16.mxu1 %v493_v43 }
  0x77   :  { %468 = vmatpush3.bf16.msra.mxu0 %v465_v30  ;;  %496 = vmatpush3.bf16.msra.mxu1 %v493_v43 }
  0x78   :  { %470 = vmatprep.subr.bf16.mxu0 %v469_v33  ;;  %498 = vmatprep.subr.bf16.mxu1 %v497_v46 }
  0x7b   :  { %472 = vmatpush3.bf16.msra.mxu0 %v469_v33  ;;  %500 = vmatpush3.bf16.msra.mxu1 %v497_v46 }
  0x7c   :  { %502 = vmatprep.subr.bf16.mxu1 %v501_v49 }
  0x7e   :  { %404 = vmatmul.mubr.f32.vlgmr.msra.gmra.mrb[0].mxu0 %v92_v34 }
  0x7f   :  { %504 = vmatpush3.bf16.msra.mxu1 %v501_v49 }
 0x151   :  { %v405_v51 = vpop.f32.mrb[0].mxu0 }
 0x152   :  { %v188_v52 = vadd.f32 %v405_v51, %v333_v50  ;;  %v182_v53 = vpop.f32.mrb[1].mxu0 }
 0x153   :  { %v183_v54 = vadd.f32 %v333_v50, %v182_v53 }
 0x154   :  { %v194_v55 = vmul.f32 0.70710677, %v188_v52  ;;  %v192_v62 = vmul.f32 0.5, %v188_v52 }
 0x155   :  { %v193_v56 = vmul.f32 0.70710677, %v183_v54  ;;  %v191_v60 = vmul.f32 0.5, %v183_v54 }
 0x156   :  { %513 = verf.f32 %v194_v55 }
 0x157   :  { %515 = verf.f32 %v193_v56 }
 0x160   :  { %v514_v57 = vpop.eup %513 }
 0x161   :  { %v516_v58 = vpop.eup %515  ;;  %v198_v59 = vadd.f32 1.0, %v514_v57 }
 0x162   :  { %v197_v61 = vadd.f32 1.0, %v516_v58 }
 0x163   :  { %v200_v0 = vmul.f32 %v198_v59, %v192_v62 }
 0x164   :  { %v199_v63 = vmul.f32 %v197_v61, %v191_v60 }
 0x166   :  { %438 = vmatprep.mubr.f32.mxu1 %v199_v63 }
 0x167   :  { %439 = vmatmul.mubr.f32.vlgmr.msra.gmra.mrb[0].mxu1 %v200_v0 }
 0x23a   :  { %v440_v2 = vpop.f32.mrb[0].mxu1 }
 0x23b   :  { %v311_v3 = vadd.f32 %v440_v2, %v334_v1  ;;  %v285_v4 = vpop.f32.mrb[1].mxu1 }
 0x23c   :  { %v310_v5 = vadd.f32 %v334_v1, %v285_v4 }
 0x23d   :  { %313 = vst [vmem:[#allocation12 + $0x8] sm:$0xff] %v311_v3 }
 0x23e   :  { %312 = vst [vmem:[#allocation12] sm:$0xff] %v310_v5 }
 0x23f   :  { %638 = shalt.err (!%p635_p2)
}
 0x240   :  { %s639_s9 = scalar_lea.hbm %s791_s5, 256 }
 0x241   :  { %p640_p3 = scmp.ne.s32.totalorder %s791_s5, %s639_s9  ;;  %p643_p4 = scmp.lt.u32.totalorder %s639_s9, %s791_s5 }
 0x243   :  { %p645_p5 = pnand %p643_p4, %p640_p3 }
 0x245   :  { %648 = shalt.err (!%p645_p5)
}
 0x246   :  { %325 = dma.vmem_to_hbm [thread:$0]  %s320_s3, 256, %s791_s5, [#allocation5], %s659_s30, %s659_s30, %s660_s6  }
 0x247   :  { %655 = dma.done.wait [#allocation5], 256  }
 0x248   :  { %656 = vsyncadd [#allocation5], 4294967040 }
 0x249   :  { %329 = vsyncpa [#allocation4], 1 }
 0x24a   :  { %330 = vsyncpa [#allocation7], 1 }
 0x24b   :  { %331 = vsyncpa [#allocation10], 1 }
 0x24c   :  { %332 = vsyncpa [#allocation5], 1 }

</bundles_post_ra>
